<compile_context>
chip_gen: v7x
topology: tpu7x:2x2x1
jax: 0.10.0
libtpu: 0.0.40
codegen_flags: <defaults>
</compile_context>

<pallas_src>
import functools

import jax
import jax.numpy as jnp
from jax.experimental import pallas as pl
from jax.experimental.pallas import tpu as pltpu

LANE = 128  # TPU lane width: all feature dims are padded to a multiple of this.


def _round_up(n, m):
    return ((n + m - 1) // m) * m


def fc_count_kernel(x_ref, w0_ref, w12_ref, m_in_ref, y_ref, m_ref, *, p_h, p_y):
    """One fused step of the 3-layer MLP + ReLU + running-max update.

    x_ref   : (B, p_x)            bf16, this step's (flattened) batch
    w0_ref  : (p_x, p_h)          bf16, layer-0 weights (VMEM-resident across steps)
    w12_ref : (p_h, p_h + p_y)    bf16, [W1 | W2] coalesced (VMEM-resident)
    m_in_ref: (1, 2*p_h + p_y)    f32,  incoming max state (read once, step 0)
    y_ref   : (B, p_y)            f32,  this step's padded output
    m_ref   : (1, 2*p_h + p_y)    f32,  running max accumulator (grid-resident,
                                        aliased to the m_in HBM buffer)
    """
    step = pl.program_id(0)

    # Seed the resident accumulator from the previous state once.
    @pl.when(step == 0)
    def _():
        m_ref[...] = m_in_ref[...]

    x = x_ref[...]                                            # bf16 already

    # layer 0: inp = relu(x @ W0)
    inp = jnp.maximum(
        jnp.dot(x, w0_ref[...], preferred_element_type=jnp.float32), 0.0)
    m_ref[:, 0:p_h] = jnp.maximum(
        m_ref[:, 0:p_h], jnp.max(inp, axis=0, keepdims=True))

    # layer 1: h1 = relu(inp @ W1)
    h1 = jnp.maximum(
        jnp.dot(inp.astype(jnp.bfloat16), w12_ref[:, 0:p_h],
                preferred_element_type=jnp.float32), 0.0)
    m_ref[:, p_h:2 * p_h] = jnp.maximum(
        m_ref[:, p_h:2 * p_h], jnp.max(h1, axis=0, keepdims=True))

    # layer 2: y = relu(h1 @ W2)
    y = jnp.maximum(
        jnp.dot(h1.astype(jnp.bfloat16), w12_ref[:, p_h:p_h + p_y],
                preferred_element_type=jnp.float32), 0.0)
    m_ref[:, 2 * p_h:2 * p_h + p_y] = jnp.maximum(
        m_ref[:, 2 * p_h:2 * p_h + p_y], jnp.max(y, axis=0, keepdims=True))

    y_ref[...] = y


def prepare_params(w0, w1, w2):
    """One-time weight preparation.

    PyTorch Linear weights (out, in) -> transposed to (in, out), zero-padded to
    128-lane multiples, cast to bf16, and W1|W2 coalesced into one buffer (one
    DMA instead of two).  Returns ((w0t, w12t), dims).
    """
    n_h0, n_x = w0.shape
    n_h1 = w1.shape[0]
    n_y = w2.shape[0]
    assert w1.shape[1] == n_h0 and w2.shape[1] == n_h1

    p_x = _round_up(n_x, LANE)
    p_h = max(_round_up(n_h0, LANE), _round_up(n_h1, LANE))
    p_y = _round_up(n_y, LANE)

    w0t = jnp.zeros((p_x, p_h), jnp.bfloat16).at[:n_x, :n_h0].set(
        w0.T.astype(jnp.bfloat16))
    w12t = jnp.zeros((p_h, p_h + p_y), jnp.bfloat16)
    w12t = w12t.at[:n_h0, :n_h1].set(w1.T.astype(jnp.bfloat16))
    w12t = w12t.at[:n_h1, p_h:p_h + n_y].set(w2.T.astype(jnp.bfloat16))

    dims = dict(n_x=n_x, n_h0=n_h0, n_h1=n_h1, n_y=n_y,
                p_x=p_x, p_h=p_h, p_y=p_y)
    return (w0t, w12t), dims


def init_max_state(dims):
    """reset_max_count(): one coalesced, lane-padded (1, 2*p_h + p_y) f32 buffer."""
    return jnp.zeros((1, 2 * dims["p_h"] + dims["p_y"]), jnp.float32)


def unpack_max_state(state, dims):
    """Split the coalesced state back into (maxin_act, maxh1_act, maxh2_act)."""
    p_h = dims["p_h"]
    return (state[0, :dims["n_h0"]],
            state[0, p_h:p_h + dims["n_h1"]],
            state[0, 2 * p_h:2 * p_h + dims["n_y"]])


def make_fc_count_forward(dims):
    """Builds jitted forward functions closed over the (static) padded dims.

    Returns (forward, forward_steps):
      forward(x, params, state)        -- one FC_Count_Net.forward() call.
      forward_steps(xs, params, state) -- T calls fused into one pallas_call;
                                          xs has a leading step axis (T, B, ...).
    Both return the lane-dense padded output and the new max state; the state
    argument is donated (updated in place via input_output_aliases).
    """
    n_x = dims["n_x"]
    p_x, p_h, p_y = dims["p_x"], dims["p_h"], dims["p_y"]
    kernel = functools.partial(fc_count_kernel, p_h=p_h, p_y=p_y)

    def _forward_steps(xs, params, max_state):
        w0t, w12t = params
        T, B = xs.shape[0], xs.shape[1]

        # torch .view(B, -1) per step, bf16 cast in the wrapper (not in-kernel).
        xs2 = xs.reshape(T, B, -1).astype(jnp.bfloat16)
        if p_x != n_x:
            xs2 = jnp.pad(xs2, ((0, 0), (0, 0), (0, p_x - n_x)))

        state_w = 2 * p_h + p_y
        flops = 2 * T * B * (p_x * p_h + p_h * p_h + p_h * p_y)
        bytes_accessed = int(xs2.size * 2                      # bf16 activations
                             + (w0t.size + w12t.size) * 2      # bf16 weights (once)
                             + state_w * 4 * 2                 # state read + write
                             + T * B * p_y * 4)                # y writeback

        ys, new_state = pl.pallas_call(
            kernel,
            grid=(T,),
            in_specs=[
                pl.BlockSpec((None, B, p_x), lambda t: (t, 0, 0)),   # x: per step
                pl.BlockSpec((p_x, p_h), lambda t: (0, 0)),          # W0: resident
                pl.BlockSpec((p_h, p_h + p_y), lambda t: (0, 0)),    # W1|W2: resident
                pl.BlockSpec((1, state_w), lambda t: (0, 0)),        # state in
            ],
            out_specs=(
                pl.BlockSpec((None, B, p_y), lambda t: (t, 0, 0)),   # y: per step
                pl.BlockSpec((1, state_w), lambda t: (0, 0)),        # state accum
            ),
            out_shape=(
                jax.ShapeDtypeStruct((T, B, p_y), jnp.float32),
                jax.ShapeDtypeStruct((1, state_w), jnp.float32),
            ),
            input_output_aliases={3: 1},   # update max state in place
            compiler_params=pltpu.CompilerParams(
                dimension_semantics=("arbitrary",)),
            cost_estimate=pl.CostEstimate(
                flops=flops, transcendentals=0, bytes_accessed=bytes_accessed),
        )(xs2, w0t, w12t, max_state)
        return ys, new_state

    forward_steps = jax.jit(_forward_steps, donate_argnums=(2,))

    def forward(x, params, max_state):
        ys, new_state = forward_steps(x[None], params, max_state)
        return ys[0], new_state

    return forward, forward_steps


def _init_linear_weight(key, out_features, in_features):
    """PyTorch nn.Linear default init: U(-1/sqrt(in), 1/sqrt(in))."""
    bound = 1.0 / jnp.sqrt(jnp.float32(in_features))
    return jax.random.uniform(
        key, (out_features, in_features), jnp.float32, -bound, bound)


if __name__ == "__main__":
    # Small shapes consistent with the module: x flattens to n_x features.
    B, C, H, W = 2, 4, 16, 16
    T = 4                             # a few forward() steps fused into one call
    n_x = C * H * W                   # 1024
    n_h = [32, 32]
    n_y = 16

    key = jax.random.PRNGKey(0)
    kx, k0, k1, k2 = jax.random.split(key, 4)

    xs = jax.random.normal(kx, (T, B, C, H, W), jnp.float32)
    w0 = _init_linear_weight(k0, n_h[0], n_x)
    w1 = _init_linear_weight(k1, n_h[1], n_h[0])
    w2 = _init_linear_weight(k2, n_y, n_h[1])

    params, dims = prepare_params(w0, w1, w2)        # one-time init
    forward, forward_steps = make_fc_count_forward(dims)
    state = init_max_state(dims)                     # reset_max_count()

    # Fused multi-step path: T forward() calls in one pallas_call.
    ys_pad, state = forward_steps(xs, params, state)     # state donated in place
    jax.block_until_ready((ys_pad, state))

    ys = ys_pad[:, :, :n_y]                               # slice once, at the end
    mi, mh1, mh2 = unpack_max_state(state, dims)

    # --- bf16-matched reference (same numerics as the kernel), stepped T times ---
    w0b, w1b, w2b = (w.T.astype(jnp.bfloat16) for w in (w0, w1, w2))
    m0r = jnp.zeros((n_h[0],), jnp.float32)
    m1r = jnp.zeros((n_h[1],), jnp.float32)
    m2r = jnp.zeros((n_y,), jnp.float32)
    ys_ref = []
    for t in range(T):
        xb = xs[t].reshape(B, -1).astype(jnp.bfloat16)
        inp_r = jnp.maximum(
            jnp.dot(xb, w0b, preferred_element_type=jnp.float32), 0.0)
        m0r = jnp.maximum(m0r, jnp.max(inp_r, axis=0))
        h1_r = jnp.maximum(
            jnp.dot(inp_r.astype(jnp.bfloat16), w1b,
                    preferred_element_type=jnp.float32), 0.0)
        m1r = jnp.maximum(m1r, jnp.max(h1_r, axis=0))
        y_r = jnp.maximum(
            jnp.dot(h1_r.astype(jnp.bfloat16), w2b,
                    preferred_element_type=jnp.float32), 0.0)
        m2r = jnp.maximum(m2r, jnp.max(y_r, axis=0))
        ys_ref.append(y_r)
    ys_ref = jnp.stack(ys_ref)

    assert jnp.allclose(ys, ys_ref, atol=1e-2, rtol=1e-2), "output mismatch"
    assert jnp.allclose(mi, m0r, atol=1e-2, rtol=1e-2), "maxin_act mismatch"
    assert jnp.allclose(mh1, m1r, atol=1e-2, rtol=1e-2), "maxh1_act mismatch"
    assert jnp.allclose(mh2, m2r, atol=1e-2, rtol=1e-2), "maxh2_act mismatch"

    # Single-step (module forward()) path also works and keeps updating state.
    y1_pad, state = forward(xs[0], params, state)
    jax.block_until_ready((y1_pad, state))

    # --- loose parity against the f32 PyTorch-equivalent math (bf16 weights) ---
    xr = xs[0].reshape(B, -1)
    inp_f = jnp.maximum(xr @ w0.T, 0.0)
    h1_f = jnp.maximum(inp_f @ w1.T, 0.0)
    y_f = jnp.maximum(h1_f @ w2.T, 0.0)
    assert jnp.allclose(y1_pad[:, :n_y], y_f, atol=5e-2, rtol=5e-2), \
        "f32 parity mismatch"

    print("KERNEL_OK")
</pallas_src>

<mosaic_0001>
module attributes {stable_mosaic.version = 11 : i64} {
  func.func @fc_count_kernel(%arg0: i32, %arg1: memref<1x2x1024xbf16, #tpu.memory_space<vmem>>, %arg2: memref<1024x128xbf16, #tpu.memory_space<vmem>>, %arg3: memref<128x256xbf16, #tpu.memory_space<vmem>>, %arg4: memref<1x384xf32, #tpu.memory_space<vmem>>, %arg5: memref<1x2x128xf32, #tpu.memory_space<vmem>>, %arg6: memref<1x384xf32, #tpu.memory_space<vmem>>) attributes {dimension_semantics = [#tpu.dimension_semantics<arbitrary>], iteration_bounds = array<i64: 4>, scalar_prefetch = 0 : i64, scratch_operands = 0 : i64, tpu.core_type = #tpu.core_type<tc>, window_params = [{transform_indices = @transform_0, window_bounds = array<i64: 1, 2, 1024>}, {pipeline_mode = #tpu.pipeline_mode<synchronous>, transform_indices = @transform_1, window_bounds = array<i64: 1024, 128>}, {pipeline_mode = #tpu.pipeline_mode<synchronous>, transform_indices = @transform_2, window_bounds = array<i64: 128, 256>}, {pipeline_mode = #tpu.pipeline_mode<synchronous>, transform_indices = @transform_3, window_bounds = array<i64: 1, 384>}, {transform_indices = @transform_4, window_bounds = array<i64: 1, 2, 128>}, {pipeline_mode = #tpu.pipeline_mode<synchronous>, transform_indices = @transform_5, window_bounds = array<i64: 1, 384>}]} {
    %c0_i32 = arith.constant 0 : i32
    %0 = arith.cmpi eq, %arg0, %c0_i32 : i32
    %1 = arith.extui %0 : i1 to i32
    %c0_i32_0 = arith.constant 0 : i32
    %2 = arith.cmpi ne, %1, %c0_i32_0 : i32
    scf.if %2 {
      %c0_30 = arith.constant 0 : index
      %c0_31 = arith.constant 0 : index
      %37 = vector.load %arg4[%c0_30, %c0_31] : memref<1x384xf32, #tpu.memory_space<vmem>>, vector<1x384xf32>
      %c0_32 = arith.constant 0 : index
      %c0_33 = arith.constant 0 : index
      %38 = vector.load %arg6[%c0_32, %c0_33] : memref<1x384xf32, #tpu.memory_space<vmem>>, vector<1x384xf32>
      tpu.vector_store %arg6[%c0_32, %c0_33], %37 {strides = array<i32>} : memref<1x384xf32, #tpu.memory_space<vmem>>, vector<1x384xf32>,
    } else {
    }
    %c0 = arith.constant 0 : index
    %c0_1 = arith.constant 0 : index
    %c0_2 = arith.constant 0 : index
    %3 = vector.load %arg1[%c0, %c0_1, %c0_2] : memref<1x2x1024xbf16, #tpu.memory_space<vmem>>, vector<1x2x1024xbf16>
    %4 = vector.shape_cast %3 : vector<1x2x1024xbf16> to vector<2x1024xbf16>
    %c0_3 = arith.constant 0 : index
    %c0_4 = arith.constant 0 : index
    %5 = vector.load %arg2[%c0_3, %c0_4] : memref<1024x128xbf16, #tpu.memory_space<vmem>>, vector<1024x128xbf16>
    %cst = arith.constant dense<0.000000e+00> : vector<2x128xf32>
    %6 = tpu.matmul %4, %5, %cst {dimension_numbers = #tpu.dot_dimension_numbers<[1], [0], [0], [1], [0, 0, 1, 1], [], []>} : vector<2x1024xbf16>, vector<1024x128xbf16>, vector<2x128xf32> -> vector<2x128xf32>
    %cst_5 = arith.constant 0.000000e+00 : f32
    %7 = vector.broadcast %cst_5 : f32 to vector<2x128xf32>
    %8 = arith.maximumf %6, %7 : vector<2x128xf32>
    %c0_6 = arith.constant 0 : index
    %c0_7 = arith.constant 0 : index
    %9 = vector.load %arg6[%c0_6, %c0_7] : memref<1x384xf32, #tpu.memory_space<vmem>>, vector<1x128xf32>
    %cst_8 = arith.constant dense<0xFF800000> : vector<128xf32>
    %10 = vector.multi_reduction <maximumf>, %8, %cst_8 [0] : vector<2x128xf32> to vector<128xf32>
    %11 = vector.shape_cast %10 : vector<128xf32> to vector<1x128xf32>
    %12 = arith.maximumf %9, %11 : vector<1x128xf32>
    %c0_9 = arith.constant 0 : index
    %c0_10 = arith.constant 0 : index
    %13 = vector.load %arg6[%c0_9, %c0_10] : memref<1x384xf32, #tpu.memory_space<vmem>>, vector<1x128xf32>
    tpu.vector_store %arg6[%c0_9, %c0_10], %12 {strides = array<i32>} : memref<1x384xf32, #tpu.memory_space<vmem>>, vector<1x128xf32>,
    %14 = arith.truncf %8 : vector<2x128xf32> to vector<2x128xbf16>
    %c0_11 = arith.constant 0 : index
    %c0_12 = arith.constant 0 : index
    %15 = vector.load %arg3[%c0_11, %c0_12] : memref<128x256xbf16, #tpu.memory_space<vmem>>, vector<128x128xbf16>
    %cst_13 = arith.constant dense<0.000000e+00> : vector<2x128xf32>
    %16 = tpu.matmul %14, %15, %cst_13 {dimension_numbers = #tpu.dot_dimension_numbers<[1], [0], [0], [1], [0, 0, 1, 1], [], []>} : vector<2x128xbf16>, vector<128x128xbf16>, vector<2x128xf32> -> vector<2x128xf32>
    %cst_14 = arith.constant 0.000000e+00 : f32
    %17 = vector.broadcast %cst_14 : f32 to vector<2x128xf32>
    %18 = arith.maximumf %16, %17 : vector<2x128xf32>
    %c0_15 = arith.constant 0 : index
    %c128 = arith.constant 128 : index
    %19 = vector.load %arg6[%c0_15, %c128] : memref<1x384xf32, #tpu.memory_space<vmem>>, vector<1x128xf32>
    %cst_16 = arith.constant dense<0xFF800000> : vector<128xf32>
    %20 = vector.multi_reduction <maximumf>, %18, %cst_16 [0] : vector<2x128xf32> to vector<128xf32>
    %21 = vector.shape_cast %20 : vector<128xf32> to vector<1x128xf32>
    %22 = arith.maximumf %19, %21 : vector<1x128xf32>
    %c0_17 = arith.constant 0 : index
    %c128_18 = arith.constant 128 : index
    %23 = vector.load %arg6[%c0_17, %c128_18] : memref<1x384xf32, #tpu.memory_space<vmem>>, vector<1x128xf32>
    tpu.vector_store %arg6[%c0_17, %c128_18], %22 {strides = array<i32>} : memref<1x384xf32, #tpu.memory_space<vmem>>, vector<1x128xf32>,
    %24 = arith.truncf %18 : vector<2x128xf32> to vector<2x128xbf16>
    %c0_19 = arith.constant 0 : index
    %c128_20 = arith.constant 128 : index
    %25 = vector.load %arg3[%c0_19, %c128_20] : memref<128x256xbf16, #tpu.memory_space<vmem>>, vector<128x128xbf16>
    %cst_21 = arith.constant dense<0.000000e+00> : vector<2x128xf32>
    %26 = tpu.matmul %24, %25, %cst_21 {dimension_numbers = #tpu.dot_dimension_numbers<[1], [0], [0], [1], [0, 0, 1, 1], [], []>} : vector<2x128xbf16>, vector<128x128xbf16>, vector<2x128xf32> -> vector<2x128xf32>
    %cst_22 = arith.constant 0.000000e+00 : f32
    %27 = vector.broadcast %cst_22 : f32 to vector<2x128xf32>
    %28 = arith.maximumf %26, %27 : vector<2x128xf32>
    %c0_23 = arith.constant 0 : index
    %c256 = arith.constant 256 : index
    %29 = vector.load %arg6[%c0_23, %c256] : memref<1x384xf32, #tpu.memory_space<vmem>>, vector<1x128xf32>
    %cst_24 = arith.constant dense<0xFF800000> : vector<128xf32>
    %30 = vector.multi_reduction <maximumf>, %28, %cst_24 [0] : vector<2x128xf32> to vector<128xf32>
    %31 = vector.shape_cast %30 : vector<128xf32> to vector<1x128xf32>
    %32 = arith.maximumf %29, %31 : vector<1x128xf32>
    %c0_25 = arith.constant 0 : index
    %c256_26 = arith.constant 256 : index
    %33 = vector.load %arg6[%c0_25, %c256_26] : memref<1x384xf32, #tpu.memory_space<vmem>>, vector<1x128xf32>
    tpu.vector_store %arg6[%c0_25, %c256_26], %32 {strides = array<i32>} : memref<1x384xf32, #tpu.memory_space<vmem>>, vector<1x128xf32>,
    %c0_27 = arith.constant 0 : index
    %c0_28 = arith.constant 0 : index
    %c0_29 = arith.constant 0 : index
    %34 = vector.load %arg5[%c0_27, %c0_28, %c0_29] : memref<1x2x128xf32, #tpu.memory_space<vmem>>, vector<1x2x128xf32>
    %35 = vector.shape_cast %34 : vector<1x2x128xf32> to vector<2x128xf32>
    %36 = vector.shape_cast %28 : vector<2x128xf32> to vector<1x2x128xf32>
    tpu.vector_store %arg5[%c0_27, %c0_28, %c0_29], %36 {strides = array<i32>} : memref<1x2x128xf32, #tpu.memory_space<vmem>>, vector<1x2x128xf32>,
    return
  }
  func.func @transform_0(%arg0: i32) -> (i32, i32, i32) {
    %c0_i32 = arith.constant 0 : i32
    %c0_i32_0 = arith.constant 0 : i32
    %c0_i32_1 = arith.constant 0 : i32
    return %arg0, %c0_i32, %c0_i32_0 : i32, i32, i32
  }
  func.func @transform_1(%arg0: i32) -> (i32, i32) {
    %c0_i32 = arith.constant 0 : i32
    %c0_i32_0 = arith.constant 0 : i32
    %c0_i32_1 = arith.constant 0 : i32
    return %c0_i32, %c0_i32_0 : i32, i32
  }
  func.func @transform_2(%arg0: i32) -> (i32, i32) {
    %c0_i32 = arith.constant 0 : i32
    %c0_i32_0 = arith.constant 0 : i32
    %c0_i32_1 = arith.constant 0 : i32
    return %c0_i32, %c0_i32_0 : i32, i32
  }
  func.func @transform_3(%arg0: i32) -> (i32, i32) {
    %c0_i32 = arith.constant 0 : i32
    %c0_i32_0 = arith.constant 0 : i32
    %c0_i32_1 = arith.constant 0 : i32
    return %c0_i32, %c0_i32_0 : i32, i32
  }
  func.func @transform_4(%arg0: i32) -> (i32, i32, i32) {
    %c0_i32 = arith.constant 0 : i32
    %c0_i32_0 = arith.constant 0 : i32
    %c0_i32_1 = arith.constant 0 : i32
    return %arg0, %c0_i32, %c0_i32_0 : i32, i32, i32
  }
  func.func @transform_5(%arg0: i32) -> (i32, i32) {
    %c0_i32 = arith.constant 0 : i32
    %c0_i32_0 = arith.constant 0 : i32
    %c0_i32_1 = arith.constant 0 : i32
    return %c0_i32, %c0_i32_0 : i32, i32
  }
}

</mosaic_0001>

<bundles_post_ra>
// kernel: _forward_steps.1
= control target key start
LH: loop header
LB: loop body
LE: loop exit
PB: predicated region body
PF: predicated region fallthrough
CT: control target
= control target key end

     0   :  { %11 = vsyncpa [#allocation3], 0  ;;  %s2318_s0 = inlined_call_operand.vmem [shape: bf16[4,2,1024], index: 0, kind: input, shape index: {}]   ;;  %s2319_s1 = inlined_call_operand.vmem [shape: bf16[1024,128], index: 1, kind: input, shape index: {}]   ;;  %s2320_s2 = inlined_call_operand.vmem [shape: bf16[128,256], index: 2, kind: input, shape index: {}]   ;;  %s2321_s3 = inlined_call_operand.hbm [shape: f32[1,384], index: 3, kind: input, shape index: {}, may-alias: {3,5}]   ;;  %s2322_s4 = inlined_call_operand.hbm [shape: f32[4,2,128], index: 4, kind: output, shape index: {0}]   ;;  %s2323_s5 = inlined_call_operand.hbm [shape: f32[1,384], index: 5, kind: output, shape index: {1}, may-alias: {3,5}]  }
   0x1   :  { %12 = vsyncpa [#allocation4], 0 }
   0x2   :  { %14 = vsyncpa [#allocation4 + $0x1], 0 }
   0x3   :  { %15 = vsyncpa [#allocation7], 0  ;;  %s1874_s18 = smov 0   ;;  %s1876_s19 = smov 0  }
   0x4   :  { %s1878_s20 = smov 0   ;;  %s1880_s21 = smov 0  }
   0x5 LB: > { %s1895_s22 = sadd.s32 4294967295, %s1836_s21   ;;  %s1330_s23 = sadd.s32 4294967294, %s1836_s21   ;;  %s1836_s21 = sphi %s1880_s21, %s2348_s21   ;;  %s1832_s20 = sphi %s1878_s20, %s2347_s20   ;;  %s1828_s19 = sphi %s1876_s19, %s2346_s19   ;;  %s1824_s18 = sphi %s1874_s18, %s2345_s18  }
   0x6   : > { %s1899_s24 = sadd.s32 1, %s1836_s21   ;;  %s117_s25 = sadd.s32 1, %s1832_s20 }
   0x7   : > { %s114_s26 = ssub.s32 %s1836_s21, %s1899_s24  ;;  %p127_p0 = scmp.ne.s32.totalorder %s1832_s20, %s1828_s19 }
   0x8   : > { %p115_p1 = scmp.eq.s32.totalorder %s114_s26, 0  ;;  %p2324_p2 = scmp.eq.s32.totalorder %s1895_s22, 3 }
   0x9   : > { %p133_p3 = scmp.ne.s32.totalorder %s1828_s19, %s1824_s18  ;;  %p134_p4 = scmp.eq.s32.totalorder %s1330_s23, 3 }
   0xa   : > { %s1910_s27 = scalar_select %p115_p1, %s1832_s20, %s117_s25  }
   0xb   : > { %p1914_p5 = por %p2324_p2, %p127_p0  ;;  %p1918_p6 = por %p134_p4, %p133_p3 }
   0xc   : > { %p1331_p7 = scmp.ge.s32.totalorder %s1836_s21, 1  ;;  %p162_p8 = scmp.lt.s32.totalorder %s1836_s21, 5 }
   0xd   : > { %s2328_s28 = scalar_select %p1914_p5, 1, 0 }
   0xe   : > { %s2329_s29 = scalar_select %p1918_p6, 1, 0 }
   0xf   : > { %p2325_p10 = scmp.eq.s32.totalorder %s1895_s22, 0  ;;  %p1926_p11 = pnand %p1331_p7, %p162_p8 }
  0x10   : > { %s1838_s6 = smov [#allocation2]   ;;  %s1712_s11 = scalar_lea.hbm %s2321_s3, 48 }
  0x11   : > { %s2330_s30 = scalar_select %p1926_p11, 1, 0 }
  0x12   : > { %s181_s7 = sshll.u32 %s1838_s6, 4  ;;  %p1581_p12 = pneg %p1926_p11  ;;  %s182_s7 = int_to_ptr.vmem [resolvable:$true] %s181_s7 }
  0x13   : > { %p1713_p0 = scmp.ne.s32.totalorder %s2321_s3, %s1712_s11  ;;  %p1719_p7 = scmp.lt.u32.totalorder %s1712_s11, %s2321_s3 }
  0x14   : > { %p1934_p13 = pnand %p2325_p10, %p1581_p12 }
  0x16   : > { %p1714_p1 = pneg %p1934_p13 }
  0x18   : > { %p1715_p3 = pnand %p1714_p1, %p1713_p0 }
  0x1a   : > { %p1716_p4 = pneg %p1715_p3 }
  0x1c   : > { %p1721_p8 = pnand %p1719_p7, %p1716_p4 }
  0x1e   : > { %1724 = shalt.err (!%p1721_p8)
}
  0x1f   : > { %s1725_s16 = scalar_lea.vmem %s182_s7, 48  ;;  %s1732_s17 = scalar_lea.vmem %s182_s7, 64 }
  0x20   : > { %p1726_p12 = scmp.ne.s32.totalorder %s182_s7, %s1725_s16  ;;  %p1733_p10 = scmp.lt.s32.totalorder %s182_s7, %s182_s7 }
  0x21   : > { %p1734_p6 = scmp.lt.s32.totalorder %s1732_s17, %s1725_s16 }
  0x22   : > { %p1728_p2 = pnand %p1726_p12, %p1714_p1 }
  0x23   : > { %p1735_p5 = por %p1734_p6, %p1733_p10 }
  0x24   : > { %p1729_p9 = pneg %p1728_p2 }
  0x26   : > { %p1736_p11 = pnand %p1735_p5, %p1729_p9 }
  0x28   : > { %1739 = shalt.err (!%p1736_p11)
}
  0x29   : > { %1584 = dma.hbm_to_vmem [thread:$0]  (!%p1934_p13), %s2321_s3, 48, %s182_s7, [#allocation3]  }
  0x2a   : > { %p2332_p0 = scmp.ne.s32.totalorder %s2330_s30, 0 }
  0x2b   : > { %p2333_p3 = scmp.eq.s32.totalorder (!%p2332_p0), %s1895_s22, 0 }
  0x2c   : > { %201 = sbr.rel (%p2332_p0) target bundleno = 826 (0x33a), region = 36 }
  0x33   : > { %1811 = dma.done.wait (%p2333_p3), [#allocation3], 48   ;;  %p2334_p2 = pmov %p2333_p3 }
  0x34   : > { %s223_s26 = sand.u32 1, %s1828_s19   ;;  %p228_p5 = scmp.lt.s32.totalorder %s1895_s22, 3 }
  0x35   : > { %1813 = vsyncadd (%p2334_p2), [#allocation3], 4294967248  ;;  %s1964_s6 = sshll.u32 %s223_s26, 1  ;;  %p2335_p6 = scmp.ne.s32.totalorder %s1895_s22, 0 }
  0x36   : > { %s229_s7 = scalar_select %p228_p5, %s1895_s22, 3 }
  0x37   : > { %s225_s11 = scalar_lea.vmem [#allocation5], %s1964_s6  ;;  %236 = sbr.rel (%p2335_p6) target bundleno = 62 (0x3e), region = 44  ;;  %v237_v0 = vld [vmem:[#allocation2] sm:$0x7] (!%p2335_p6)  ;;  %v238_v1 = vlaneseq (!%p2335_p6) }
  0x38   : > { %s1337_s8 = sshll.u32 %s229_s7, 3 }
  0x39   : > { %s1970_s10 = scalar_lea.vmem %s2318_s0, %s1337_s8  ;;  %vm240_vm0 = vcmp.lt.s32.totalorder (!%p2335_p6), %v238_v1, 384 }
  0x3a   : > { %242 = vst.msk [vmem:[#allocation6] sm:$0x7] (!%p2335_p6), %vm240_vm0, %v237_v0 }
  0x3e PF: > { %v1631_v2 = vld [vmem:[%s2319_s1 + $0x40] sm:$0xff]   ;;  %v1635_v6 = vld [vmem:[%s2319_s1 + $0x48] sm:$0xff]   ;;  %v1639_v10 = vld [vmem:[%s2319_s1 + $0x50] sm:$0xff]   ;;  %v377_v30 = vlaneseq  ;;  %v1839_v38 = vmov 1966171168   ;;  %vm1841_vm1 = vmmov 0  }
  0x3f   : > { %v1632_v3 = vld [vmem:[%s2319_s1 + $0xc0] sm:$0xff]   ;;  %1425 = vmatprep.subr.bf16.mxu0 %v1631_v2  ;;  %v1636_v7 = vld [vmem:[%s2319_s1 + $0xc8] sm:$0xff]   ;;  %v1640_v11 = vld [vmem:[%s2319_s1 + $0xd0] sm:$0xff]   ;;  %v375_v39 = vunpack.c.l.s4 %v1839_v38  ;;  %vm976_vm2 = vcmask 1041408   ;;  %s1420_s7 = sshll.u32 %s1895_s22, 5  ;;  %s1237_s8 = sshll.u32 %s225_s11, 4  ;;  %s2249_s8 = int_to_ptr.vmem [resolvable:$true] %s1237_s8 }
  0x40   : > { %v1633_v4 = vld [vmem:[%s2319_s1] sm:$0xff]   ;;  %1447 = vmatprep.subr.bf16.mxu1 %v1632_v3  ;;  %v1637_v8 = vld [vmem:[%s2319_s1 + $0x8] sm:$0xff]   ;;  %v1641_v12 = vld [vmem:[%s2319_s1 + $0x10] sm:$0xff]   ;;  %v378_v35 = vshrl.u32 %v377_v30, 7  ;;  %vm2229_vm3 = vcmp.lt.s32.totalorder %v377_v30, 128  ;;  %s2247_s12 = scalar_lea.hbm %s2322_s4, %s1420_s7  ;;  %s1224_s13 = scalar_lea.sflag [#allocation4], %s223_s26 }
  0x41   : > { %v1634_v5 = vld [vmem:[%s2319_s1 + $0x80] sm:$0xff]   ;;  %1426 = vmatpush3.bf16.msra.mxu0 %v1633_v4  ;;  %v1638_v9 = vld [vmem:[%s2319_s1 + $0x88] sm:$0xff]   ;;  %v1642_v13 = vld [vmem:[%s2319_s1 + $0x90] sm:$0xff]   ;;  %v376_v42 = vunpack.c.0.s8 %v375_v39  ;;  %s1740_s14 = scalar_lea.vmem %s2249_s8, 32  ;;  %p2338_p10 = scmp.ne.s32.totalorder %s2328_s28, 0 }
  0x42   : > { %1448 = vmatpush3.bf16.msra.mxu1 %v1634_v5  ;;  %1427 = vmatprep.subr.bf16.mxu0 %v1635_v6  ;;  %v1643_v14 = vld [vmem:[%s2319_s1 + $0x58] sm:$0xff]   ;;  %v1647_v18 = vld [vmem:[%s2319_s1 + $0x60] sm:$0xff]   ;;  %v1651_v22 = vld [vmem:[%s2319_s1 + $0x68] sm:$0xff]   ;;  %p1741_p9 = scmp.ne.s32.totalorder %s2249_s8, %s1740_s14  ;;  %s1842_s15 = smov [#allocation5]  }
  0x43   : > { %1449 = vmatprep.subr.bf16.mxu1 %v1636_v7  ;;  %v1644_v15 = vld [vmem:[%s2319_s1 + $0xd8] sm:$0xff]   ;;  %v1648_v19 = vld [vmem:[%s2319_s1 + $0xe0] sm:$0xff]   ;;  %v1652_v23 = vld [vmem:[%s2319_s1 + $0xe8] sm:$0xff]   ;;  %v2079_v43 = vsub.s32 %v376_v42, %v378_v35  ;;  %s1744_s16 = sshll.u32 %s1842_s15, 4  ;;  %s1745_s16 = int_to_ptr.vmem [resolvable:$false] %s1744_s16 }
  0x44   : > { %v1645_v16 = vld [vmem:[%s2319_s1 + $0x18] sm:$0xff]   ;;  %v1649_v20 = vld [vmem:[%s2319_s1 + $0x20] sm:$0xff]   ;;  %v1653_v24 = vld [vmem:[%s2319_s1 + $0x28] sm:$0xff]   ;;  %p1742_p11 = pnand %p1741_p9, %p2338_p10  ;;  %s1746_s17 = scalar_lea.vmem %s1745_s16, 64 }
  0x45   : > { %1428 = vmatpush3.bf16.msra.mxu0 %v1637_v8  ;;  %v1646_v17 = vld [vmem:[%s2319_s1 + $0x98] sm:$0xff]   ;;  %v1650_v21 = vld [vmem:[%s2319_s1 + $0xa0] sm:$0xff]   ;;  %v1654_v25 = vld [vmem:[%s2319_s1 + $0xa8] sm:$0xff]   ;;  %p1747_p1 = scmp.lt.s32.totalorder %s2249_s8, %s1745_s16  ;;  %p1748_p4 = scmp.lt.s32.totalorder %s1746_s17, %s1740_s14 }
  0x46   : > { %1450 = vmatpush3.bf16.msra.mxu1 %v1638_v9  ;;  %1429 = vmatprep.subr.bf16.mxu0 %v1639_v10  ;;  %v1655_v26 = vld [vmem:[%s2319_s1 + $0x70] sm:$0xff]   ;;  %v1659_v31 = vld [vmem:[%s2319_s1 + $0x78] sm:$0xff]   ;;  %v243_v36 = vld [vmem:[%s1970_s10] sm:$0xff]  ;;  %p1743_p13 = pneg %p1742_p11 }
  0x47   : > { %1451 = vmatprep.subr.bf16.mxu1 %v1640_v11  ;;  %v1656_v27 = vld [vmem:[%s2319_s1 + $0xf0] sm:$0xff]   ;;  %v1660_v32 = vld [vmem:[%s2319_s1 + $0xf8] sm:$0xff]   ;;  %v1664_v37 = vld [vmem:[%s2319_s1 + $0x140] sm:$0xff]   ;;  %v373_v41 = vcombine.high %v243_v36, %v243_v36  ;;  %v380_v44 = vrot.slane %v243_v36, %v2079_v43  ;;  %p1749_p7 = por %p1748_p4, %p1747_p1 }
  0x48   : > { %v1657_v28 = vld [vmem:[%s2319_s1 + $0x30] sm:$0xff]   ;;  %v1661_v33 = vld [vmem:[%s2319_s1 + $0x38] sm:$0xff]   ;;  %v1665_v40 = vld [vmem:[%s2319_s1 + $0x1c0] sm:$0xff]  }
  0x49   : > { %1430 = vmatpush3.bf16.msra.mxu0 %v1641_v12  ;;  %v1658_v29 = vld [vmem:[%s2319_s1 + $0xb0] sm:$0xff]   ;;  %v1662_v34 = vld [vmem:[%s2319_s1 + $0xb8] sm:$0xff]   ;;  %v2083_v45 = vrot.slane %v373_v41, %v2079_v43  ;;  %v388_v46 = vcombine.high %v380_v44, %v380_v44  ;;  %v396_v47 = vrot.slane %v380_v44, %v2079_v43  ;;  %v1666_v49 = vld [vmem:[%s2319_s1 + $0x100] sm:$0xff]   ;;  %p1750_p8 = pnand %p1749_p7, %p1743_p13 }
  0x4a   : > { %1452 = vmatpush3.bf16.msra.mxu1 %v1642_v13  ;;  %1431 = vmatprep.subr.bf16.mxu0 %v1643_v14  ;;  %v1667_v51 = vld [vmem:[%s2319_s1 + $0x180] sm:$0xff]   ;;  %v1668_v54 = vld [vmem:[%s2319_s1 + $0x148] sm:$0xff]   ;;  %v1672_v60 = vld [vmem:[%s2319_s1 + $0x150] sm:$0xff]  }
  0x4b   : > { %1453 = vmatprep.subr.bf16.mxu1 %v1644_v15  ;;  %v389_v48 = vcombine.high %v2083_v45, %v2083_v45  ;;  %v410_v50 = vrot.slane %v388_v46, %v2079_v43  ;;  %v418_v53 = vcombine.high %v396_v47, %v396_v47  ;;  %v1669_v56 = vld [vmem:[%s2319_s1 + $0x1c8] sm:$0xff]   ;;  %v1673_v61 = vld [vmem:[%s2319_s1 + $0x1d0] sm:$0xff]   ;;  %v1676_v0 = vld [vmem:[%s2319_s1 + $0x158] sm:$0xff]  }
  0x4c   : > { %v1670_v57 = vld [vmem:[%s2319_s1 + $0x108] sm:$0xff]   ;;  %v1674_v62 = vld [vmem:[%s2319_s1 + $0x110] sm:$0xff]   ;;  %v1677_v1 = vld [vmem:[%s2319_s1 + $0x1d8] sm:$0xff]  }
  0x4d   : > { %1432 = vmatpush3.bf16.msra.mxu0 %v1645_v16  ;;  %v417_v52 = vrot.slane %v389_v48, %v2079_v43  ;;  %846 = vmatprep.mubr.bf16.mxu0 %v410_v50  ;;  %v420_v55 = vcombine.high %v410_v50, %v410_v50  ;;  %v1671_v59 = vld [vmem:[%s2319_s1 + $0x188] sm:$0xff]   ;;  %v1675_v63 = vld [vmem:[%s2319_s1 + $0x190] sm:$0xff]   ;;  %v1678_v2 = vld [vmem:[%s2319_s1 + $0x118] sm:$0xff]  }
  0x4e   : > { %1454 = vmatpush3.bf16.msra.mxu1 %v1646_v17  ;;  %1433 = vmatprep.subr.bf16.mxu0 %v1647_v18  ;;  %v1679_v3 = vld [vmem:[%s2319_s1 + $0x198] sm:$0xff]   ;;  %v1680_v4 = vld [vmem:[%s2319_s1 + $0x160] sm:$0xff]   ;;  %v1684_v8 = vld [vmem:[%s2319_s1 + $0x168] sm:$0xff]  }
  0x4f   : > { %1455 = vmatprep.subr.bf16.mxu1 %v1648_v19  ;;  %v421_v58 = vcombine.high %v417_v52, %v417_v52  ;;  %886 = vmatprep.mubr.bf16.mxu1 %v420_v55  ;;  %v1681_v5 = vld [vmem:[%s2319_s1 + $0x1e0] sm:$0xff]   ;;  %v1685_v9 = vld [vmem:[%s2319_s1 + $0x1e8] sm:$0xff]   ;;  %v1688_v12 = vld [vmem:[%s2319_s1 + $0x170] sm:$0xff]  }
  0x50   : > { %v1682_v6 = vld [vmem:[%s2319_s1 + $0x120] sm:$0xff]   ;;  %v1686_v10 = vld [vmem:[%s2319_s1 + $0x128] sm:$0xff]   ;;  %v1689_v13 = vld [vmem:[%s2319_s1 + $0x1f0] sm:$0xff]  }
  0x51   : > { %1434 = vmatpush3.bf16.msra.mxu0 %v1649_v20  ;;  %v1683_v7 = vld [vmem:[%s2319_s1 + $0x1a0] sm:$0xff]   ;;  %v1687_v11 = vld [vmem:[%s2319_s1 + $0x1a8] sm:$0xff]   ;;  %v1690_v14 = vld [vmem:[%s2319_s1 + $0x130] sm:$0xff]   ;;  %v403_v20 = vrot.slane %v2083_v45, %v2079_v43 }
  0x52   : > { %1456 = vmatpush3.bf16.msra.mxu1 %v1650_v21  ;;  %1435 = vmatprep.subr.bf16.mxu0 %v1651_v22  ;;  %v1692_v15 = vld [vmem:[%s2319_s1 + $0x178] sm:$0xff]   ;;  %v1691_v16 = vld [vmem:[%s2319_s1 + $0x1b0] sm:$0xff]   ;;  %v1696_v22 = vld [vmem:[%s2320_s2] ss:$8 sps:$4 sm:$0xff]  }
  0x53   : > { %1457 = vmatprep.subr.bf16.mxu1 %v1652_v23  ;;  %v1693_v17 = vld [vmem:[%s2319_s1 + $0x1f8] sm:$0xff]   ;;  %v419_v21 = vcombine.high %v403_v20, %v403_v20  ;;  %v1840_v23 = vmov 0.0   ;;  %v1708_v36 = vld [vmem:[%s2320_s2 + $0x44] ss:$8 sps:$4 sm:$0xff]  }
  0x54   : > { %v1694_v18 = vld [vmem:[%s2319_s1 + $0x138] sm:$0xff]   ;;  %v1710_v38 = vld [vmem:[%s2320_s2 + $0x64] ss:$8 sps:$4 sm:$0xff]  }
  0x55   : > { %1436 = vmatpush3.bf16.msra.mxu0 %v1653_v24  ;;  %v1695_v19 = vld [vmem:[%s2319_s1 + $0x1b8] sm:$0xff]  }
  0x56   : > { %1458 = vmatpush3.bf16.msra.mxu1 %v1654_v25  ;;  %1437 = vmatprep.subr.bf16.mxu0 %v1655_v26  ;;  %v1697_v24 = vld [vmem:[%s2320_s2 + $0x10] ss:$8 sps:$4 sm:$0xff]   ;;  %v1698_v25 = vld [vmem:[%s2320_s2 + $0x20] ss:$8 sps:$4 sm:$0xff]   ;;  %v1707_v35 = vld [vmem:[%s2320_s2 + $0x34] ss:$8 sps:$4 sm:$0xff]  }
  0x57   : > { %1459 = vmatprep.subr.bf16.mxu1 %v1656_v27  ;;  %v1699_v26 = vld [vmem:[%s2320_s2 + $0x30] ss:$8 sps:$4 sm:$0xff]   ;;  %v1700_v27 = vld [vmem:[%s2320_s2 + $0x40] ss:$8 sps:$4 sm:$0xff]  }
  0x59   : > { %1438 = vmatpush3.bf16.msra.mxu0 %v1657_v28  ;;  %v1701_v28 = vld [vmem:[%s2320_s2 + $0x50] ss:$8 sps:$4 sm:$0xff]  }
  0x5a   : > { %1460 = vmatpush3.bf16.msra.mxu1 %v1658_v29  ;;  %1439 = vmatprep.subr.bf16.mxu0 %v1659_v31  ;;  %v1702_v29 = vld [vmem:[%s2320_s2 + $0x60] ss:$8 sps:$4 sm:$0xff]   ;;  %v1703_v31 = vld [vmem:[%s2320_s2 + $0x70] ss:$8 sps:$4 sm:$0xff]  }
  0x5b   : > { %1461 = vmatprep.subr.bf16.mxu1 %v1660_v32  ;;  %v1704_v32 = vld [vmem:[%s2320_s2 + $0x4] ss:$8 sps:$4 sm:$0xff]  }
  0x5d   : > { %1440 = vmatpush3.bf16.msra.mxu0 %v1661_v33  ;;  %v1705_v33 = vld [vmem:[%s2320_s2 + $0x14] ss:$8 sps:$4 sm:$0xff]  }
  0x5e   : > { %1462 = vmatpush3.bf16.msra.mxu1 %v1662_v34  ;;  %1469 = vmatprep.subr.bf16.mxu0 %v1664_v37  ;;  %v1706_v34 = vld [vmem:[%s2320_s2 + $0x24] ss:$8 sps:$4 sm:$0xff]   ;;  %v1709_v37 = vld [vmem:[%s2320_s2 + $0x54] ss:$8 sps:$4 sm:$0xff]  }
  0x5f   : > { %1491 = vmatprep.subr.bf16.mxu1 %v1665_v40 }
  0x60   : > { %847 = vmatmul.mubr.bf16.vlgmr.msra.gmra.mrb[0].mxu0 %v396_v47 }
  0x61   : > { %1470 = vmatpush3.bf16.msra.mxu0 %v1666_v49  ;;  %887 = vmatmul.mubr.bf16.vlgmr.msra.gmra.mrb[0].mxu1 %v418_v53 }
  0x62   : > { %1471 = vmatprep.subr.bf16.mxu0 %v1668_v54  ;;  %1492 = vmatpush3.bf16.msra.mxu1 %v1667_v51 }
  0x63   : > { %926 = vmatprep.mubr.bf16.mxu0 %v417_v52  ;;  %1493 = vmatprep.subr.bf16.mxu1 %v1669_v56 }
  0x64   : > { %966 = vmatprep.mubr.bf16.mxu1 %v421_v58 }
  0x65   : > { %1472 = vmatpush3.bf16.msra.mxu0 %v1670_v57 }
  0x66   : > { %1473 = vmatprep.subr.bf16.mxu0 %v1672_v60  ;;  %1494 = vmatpush3.bf16.msra.mxu1 %v1671_v59 }
  0x67   : > { %1495 = vmatprep.subr.bf16.mxu1 %v1673_v61 }
  0x69   : > { %1474 = vmatpush3.bf16.msra.mxu0 %v1674_v62 }
  0x6a   : > { %1475 = vmatprep.subr.bf16.mxu0 %v1676_v0  ;;  %1496 = vmatpush3.bf16.msra.mxu1 %v1675_v63 }
  0x6b   : > { %1497 = vmatprep.subr.bf16.mxu1 %v1677_v1 }
  0x6d   : > { %1476 = vmatpush3.bf16.msra.mxu0 %v1678_v2 }
  0x6e   : > { %1477 = vmatprep.subr.bf16.mxu0 %v1680_v4  ;;  %1498 = vmatpush3.bf16.msra.mxu1 %v1679_v3 }
  0x6f   : > { %1499 = vmatprep.subr.bf16.mxu1 %v1681_v5 }
  0x71   : > { %1478 = vmatpush3.bf16.msra.mxu0 %v1682_v6  ;;  %v975_v6 = vld [vmem:[#allocation6] sm:$0x1] }
  0x72   : > { %1479 = vmatprep.subr.bf16.mxu0 %v1684_v8  ;;  %1500 = vmatpush3.bf16.msra.mxu1 %v1683_v7 }
  0x73   : > { %1501 = vmatprep.subr.bf16.mxu1 %v1685_v9 }
  0x75   : > { %1480 = vmatpush3.bf16.msra.mxu0 %v1686_v10  ;;  %v1711_v10 = vld [vmem:[%s2320_s2 + $0x74] ss:$8 sps:$4 sm:$0xff]  }
  0x76   : > { %1481 = vmatprep.subr.bf16.mxu0 %v1688_v12  ;;  %1502 = vmatpush3.bf16.msra.mxu1 %v1687_v11 }
  0x77   : > { %1503 = vmatprep.subr.bf16.mxu1 %v1689_v13 }
  0x79   : > { %1482 = vmatpush3.bf16.msra.mxu0 %v1690_v14 }
  0x7a   : > { %1483 = vmatprep.subr.bf16.mxu0 %v1692_v15  ;;  %1504 = vmatpush3.bf16.msra.mxu1 %v1691_v16 }
  0x7b   : > { %1505 = vmatprep.subr.bf16.mxu1 %v1693_v17 }
  0x7d   : > { %1484 = vmatpush3.bf16.msra.mxu0 %v1694_v18 }
  0x7e   : > { %1506 = vmatpush3.bf16.msra.mxu1 %v1695_v19  ;;  %1531 = vmatprep.subr.bf16.mxu0 %v1840_v23 }
  0x7f   : > { %1551 = vmatprep.subr.bf16.mxu1 %v1840_v23 }
  0x80   : > { %927 = vmatmul.mubr.bf16.vlgmr.msra.gmra.mrb[4].mxu0 %v403_v20 }
  0x81   : > { %967 = vmatmul.mubr.bf16.vlgmr.msra.gmra.mrb[4].mxu1 %v419_v21  ;;  %1532 = vmatpush3.bf16.msra.mxu0 %v1696_v22  ;;  %v1096_v22 = vld [vmem:[#allocation6 + $0x1] sm:$0x1] }
  0x82   : > { %1533 = vmatprep.subr.bf16.mxu0 %v1840_v23  ;;  %1547 = vmatprep.mubr.msk.bf16.mxu0 %vm1841_vm1, %v1840_v23 }
  0x83   : > { %1567 = vmatprep.mubr.msk.bf16.mxu1 %vm1841_vm1, %v1840_v23  ;;  %1552 = vmatpush3.bf16.msra.mxu1 %v1704_v32 }
  0x84   : > { %1553 = vmatprep.subr.bf16.mxu1 %v1840_v23 }
  0x85   : > { %1534 = vmatpush3.bf16.msra.mxu0 %v1697_v24 }
  0x86   : > { %1535 = vmatprep.subr.bf16.mxu0 %v1840_v23 }
  0x87   : > { %1554 = vmatpush3.bf16.msra.mxu1 %v1705_v33 }
  0x88   : > { %1555 = vmatprep.subr.bf16.mxu1 %v1840_v23 }
  0x89   : > { %1536 = vmatpush3.bf16.msra.mxu0 %v1698_v25 }
  0x8a   : > { %1537 = vmatprep.subr.bf16.mxu0 %v1840_v23 }
  0x8b   : > { %1556 = vmatpush3.bf16.msra.mxu1 %v1706_v34 }
  0x8c   : > { %1557 = vmatprep.subr.bf16.mxu1 %v1840_v23 }
  0x8d   : > { %1538 = vmatpush3.bf16.msra.mxu0 %v1699_v26 }
  0x8e   : > { %1539 = vmatprep.subr.bf16.mxu0 %v1840_v23 }
  0x8f   : > { %1558 = vmatpush3.bf16.msra.mxu1 %v1707_v35 }
  0x90   : > { %1559 = vmatprep.subr.bf16.mxu1 %v1840_v23 }
  0x91   : > { %1540 = vmatpush3.bf16.msra.mxu0 %v1700_v27 }
  0x92   : > { %1541 = vmatprep.subr.bf16.mxu0 %v1840_v23 }
  0x93   : > { %1560 = vmatpush3.bf16.msra.mxu1 %v1708_v36 }
  0x94   : > { %1561 = vmatprep.subr.bf16.mxu1 %v1840_v23 }
  0x95   : > { %1542 = vmatpush3.bf16.msra.mxu0 %v1701_v28 }
  0x96   : > { %1543 = vmatprep.subr.bf16.mxu0 %v1840_v23 }
  0x97   : > { %1562 = vmatpush3.bf16.msra.mxu1 %v1709_v37 }
  0x98   : > { %1563 = vmatprep.subr.bf16.mxu1 %v1840_v23 }
  0x99   : > { %1544 = vmatpush3.bf16.msra.mxu0 %v1702_v29 }
  0x9a   : > { %1545 = vmatprep.subr.bf16.mxu0 %v1840_v23 }
  0x9b   : > { %1564 = vmatpush3.bf16.msra.mxu1 %v1710_v38 }
  0x9c   : > { %1565 = vmatprep.subr.bf16.mxu1 %v1840_v23 }
  0x9d   : > { %1546 = vmatpush3.bf16.msra.mxu0 %v1703_v31 }
  0x9f   : > { %1566 = vmatpush3.bf16.msra.mxu1 %v1711_v10 }
 0x133   : > { %v1441_v39 = vpop.f32.mrb[0].mxu0 }
 0x134   : > { %v1442_v40 = vpop.f32.mrb[1].mxu0  ;;  %v1463_v41 = vpop.f32.mrb[0].mxu1 }
 0x135   : > { %v1443_v42 = vadd.f32 %v1442_v40, %v1441_v39  ;;  %v1444_v43 = vpop.f32.mrb[2].mxu0  ;;  %v1464_v44 = vpop.f32.mrb[1].mxu1 }
 0x136   : > { %v1445_v45 = vpop.f32.mrb[3].mxu0  ;;  %v1465_v46 = vadd.f32 %v1464_v44, %v1463_v41  ;;  %v1466_v47 = vpop.f32.mrb[2].mxu1 }
 0x137   : > { %v1467_v48 = vpop.f32.mrb[3].mxu1 }
 0x138   : > { %v889_v49 = vadd.f32 %v1465_v46, %v1443_v42 }
 0x153   : > { %v1485_v50 = vpop.f32.mrb[4].mxu0 }
 0x154   : > { %v1486_v51 = vpop.f32.mrb[5].mxu0  ;;  %v1507_v52 = vpop.f32.mrb[4].mxu1 }
 0x155   : > { %v1487_v53 = vadd.f32 %v1486_v51, %v1485_v50  ;;  %v1488_v54 = vpop.f32.mrb[6].mxu0  ;;  %v1508_v55 = vpop.f32.mrb[5].mxu1 }
 0x156   : > { %v1489_v56 = vpop.f32.mrb[7].mxu0  ;;  %v1509_v58 = vadd.f32 %v1508_v55, %v1507_v52  ;;  %v1510_v59 = vpop.f32.mrb[6].mxu1 }
 0x157   : > { %v929_v57 = vadd.f32 %v1487_v53, %v889_v49  ;;  %v1511_v60 = vpop.f32.mrb[7].mxu1 }
 0x159   : > { %v969_v61 = vadd.f32 %v1509_v58, %v929_v57 }
 0x15b   : > { %v974_v62 = vmax.f32 %v969_v61, 0.0 }
 0x15d   : > { %v990_v63 = vpack.c.bf16 %v974_v62, %v974_v62  ;;  %v977_v0 = vsel %vm976_vm2, %v974_v62, -inf }
 0x15e   : > { %v978_v1 = vrot.slane %v977_v0, 4 }
 0x15f   : > { %1548 = vmatmul.mubr.bf16.vlgmr.msra.gmra.mrb[8].mxu0 %v990_v63 }
 0x160   : > { %v979_v2 = vmax.f32 %v977_v0, %v978_v1 }
 0x162   : > { %v980_v3 = vrot.slane %v979_v2, 2 }
 0x164   : > { %v981_v4 = vmax.f32 %v979_v2, %v980_v3 }
 0x166   : > { %v982_v5 = vrot.slane %v981_v4, 1 }
 0x168   : > { %v983_v7 = vmax.f32 %v981_v4, %v982_v5 }
 0x16a   : > { %v984_v9 = vmax.f32 %v975_v6, %v983_v7 }
 0x16c   : > { %989 = vst.msk [vmem:[#allocation6] sm:$0x1] %vm2229_vm3, %v984_v9 }
 0x232   : > { %v1089_v11 = vpop.f32.mrb[8].mxu0 }
 0x233   : > { %v1095_v12 = vmax.f32 %v1089_v11, 0.0  ;;  %v1549_v13 = vpop.f32.mrb[9].mxu0 }
 0x234   : > { %v1092_v14 = vpop.f32.mrb[10].mxu0 }
 0x235   : > { %v1097_v30 = vsel %vm976_vm2, %v1095_v12, -inf  ;;  %v1106_v15 = vpack.c.bf16 %v1095_v12, %v1095_v12  ;;  %v1550_v16 = vpop.f32.mrb[11].mxu0 }
 0x236   : > { %v1098_v17 = vrot.slane %v1097_v30, 4 }
 0x237   : > { %1568 = vmatmul.mubr.bf16.vlgmr.msra.gmra.mrb[8].mxu1 %v1106_v15 }
 0x238   : > { %v1099_v18 = vmax.f32 %v1097_v30, %v1098_v17 }
 0x23a   : > { %v1100_v19 = vrot.slane %v1099_v18, 2 }
 0x23c   : > { %v1101_v20 = vmax.f32 %v1099_v18, %v1100_v19 }
 0x23e   : > { %v1102_v21 = vrot.slane %v1101_v20, 1 }
 0x240   : > { %v1103_v23 = vmax.f32 %v1101_v20, %v1102_v21 }
 0x242   : > { %v1104_v24 = vmax.f32 %v1096_v22, %v1103_v23 }
 0x244   : > { %1105 = vst.msk [vmem:[#allocation6 + $0x1] sm:$0x1] %vm2229_vm3, %v1104_v24 }
 0x30a   : > { %v1205_v25 = vpop.f32.mrb[8].mxu1 }
 0x30b   : > { %v1211_v26 = vmax.f32 %v1205_v25, 0.0  ;;  %v1569_v27 = vpop.f32.mrb[9].mxu1 }
 0x30c   : > { %v1208_v28 = vpop.f32.mrb[10].mxu1 }
 0x30d   : > { %v1213_v29 = vsel %vm976_vm2, %v1211_v26, -inf  ;;  %1222 = vst [vmem:[%s225_s11] sm:$0x3] %v1211_v26  ;;  %v1570_v31 = vpop.f32.mrb[11].mxu1 }
 0x30e   : > { %v1214_v32 = vrot.slane %v1213_v29, 4 }
 0x30f   : > { %1753 = shalt.err (!%p1750_p8)
}
 0x310   : > { %s1754_s26 = scalar_lea.hbm %s2247_s12, 32  ;;  %s1758_s23 = scalar_lea.hbm %s2322_s4, 128 }
 0x311   : > { %p1755_p12 = scmp.ne.s32.totalorder %s2247_s12, %s1754_s26  ;;  %p1759_p2 = scmp.lt.u32.totalorder %s2247_s12, %s2322_s4 }
 0x312   : > { %p1760_p5 = scmp.lt.u32.totalorder %s1758_s23, %s1754_s26  ;;  %p1762_p9 = scmp.lt.u32.totalorder %s1754_s26, %s2247_s12 }
 0x313   : > { %p1756_p0 = pnand %p1755_p12, %p2338_p10 }
 0x314   : > { %p1761_p6 = por %p1760_p5, %p1759_p2 }
 0x315   : > { %p1757_p3 = pneg %p1756_p0 }
 0x316   : > { %p1763_p11 = por %p1762_p9, %p1761_p6 }
 0x318   : > { %p1764_p13 = pnand %p1763_p11, %p1757_p3 }
 0x31a   : > { %1767 = shalt.err (!%p1764_p13)
}
 0x31b   : > { %1575 = dma.vmem_to_hbm [thread:$0]  (%p2338_p10), %s2249_s8, 32, %s2247_s12, %s1224_s13   ;;  %v1215_v33 = vmax.f32 %v1213_v29, %v1214_v32  ;;  %v1212_v37 = vld [vmem:[#allocation6 + $0x2] sm:$0x1] }
 0x31c   : > { %s1843_s7 = smov [#allocation6]   ;;  %p2339_p4 = scmp.eq.s32.totalorder %s1895_s22, 3 }
 0x31d   : > { %v1216_v34 = vrot.slane %v1215_v33, 2  ;;  %s1248_s30 = sshll.u32 %s1843_s7, 4  ;;  %s1249_s30 = int_to_ptr.vmem [resolvable:$true] %s1248_s30 }
 0x31e   : > { %s1768_s9 = scalar_lea.vmem %s1249_s30, 48  ;;  %s1774_s28 = scalar_lea.vmem %s1249_s30, 64 }
 0x31f   : > { %v1217_v35 = vmax.f32 %v1215_v33, %v1216_v34  ;;  %p1769_p1 = scmp.ne.s32.totalorder %s1249_s30, %s1768_s9  ;;  %p1775_p10 = scmp.lt.s32.totalorder %s1249_s30, %s1249_s30 }
 0x320   : > { %p1776_p12 = scmp.lt.s32.totalorder %s1774_s28, %s1768_s9 }
 0x321   : > { %v1218_v36 = vrot.slane %v1217_v35, 1  ;;  %p1770_p7 = pnand %p1769_p1, %p2339_p4 }
 0x322   : > { %p1777_p0 = por %p1776_p12, %p1775_p10 }
 0x323   : > { %v1219_v38 = vmax.f32 %v1217_v35, %v1218_v36  ;;  %p1771_p8 = pneg %p1770_p7 }
 0x325   : > { %v1220_v39 = vmax.f32 %v1212_v37, %v1219_v38  ;;  %p1778_p3 = pnand %p1777_p0, %p1771_p8 }
 0x327   : > { %1221 = vst.msk [vmem:[#allocation6 + $0x2] sm:$0x1] %vm2229_vm3, %v1220_v39 }
 0x328   : > { %1781 = shalt.err (!%p1778_p3)
}
 0x329   : > { %s1782_s13 = scalar_lea.hbm %s2323_s5, 48  ;;  %p2340_p5 = pmov %p2339_p4 }
 0x32a   : > { %p1783_p2 = scmp.ne.s32.totalorder %s2323_s5, %s1782_s13  ;;  %p1788_p11 = scmp.lt.u32.totalorder %s1782_s13, %s2323_s5 }
 0x32c   : > { %p1784_p6 = pnand %p1783_p2, %p2340_p5 }
 0x32e   : > { %p1785_p9 = pneg %p1784_p6 }
 0x330   : > { %p1790_p13 = pnand %p1788_p11, %p1785_p9 }
 0x332   : > { %1793 = shalt.err (!%p1790_p13)
}
 0x333   : > { %p2341_p1 = pmov %p2339_p4 }
 0x335   : > { %1577 = dma.vmem_to_hbm [thread:$0]  (%p2341_p1), %s1249_s30, 48, %s2323_s5, [#allocation7]  }
 0x336   : > { %p2342_p4 = pmov %p2341_p1 }
 0x337   : > { %p2343_p7 = pmov %p2341_p1 }
 0x338   : > { %1815 = dma.done.wait (%p2342_p4), [#allocation7], 48  }
 0x339   : > { %1817 = vsyncadd (%p2343_p7), [#allocation7], 4294967248 }
 0x33a PF: > { %p1593_p8 = scmp.ge.s32.totalorder %s1836_s21, 2  ;;  %s1264_s11 = sand.u32 1, %s1824_s18  }
 0x33b   : > { %p2344_p10 = scmp.ne.s32.totalorder %s2329_s29, 0  ;;  %s1265_s23 = scalar_lea.sflag [#allocation4], %s1264_s11 }
 0x33d   : > { %p1586_p12 = pnand %p1593_p8, %p2344_p10 }
 0x33f   : > { %1819 = dma.done.wait (!%p1586_p12), %s1265_s23, 32  }
 0x340   : > { %1821 = vsyncadd (!%p1586_p12), %s1265_s23, 4294967264  ;;  %p18_p0 = scmp.ge.s32.totalorder %s1899_s24, 6   ;;  %s2345_s18 = smov %s1828_s19 }
 0x341   : > { %s2346_s19 = smov %s1832_s20  ;;  %s2347_s20 = smov %s1910_s27 }
 0x342   : > { %s2348_s21 = smov %s1899_s24  ;;  %20 = sbr.rel (!%p18_p0) target bundleno = 5 (0x5), region = 88 }
 0x349   :  { %1270 = vsyncpa [#allocation3], 1 }
 0x34a   :  { %1272 = vsyncpa [#allocation3 + $0x1], 1 }
 0x34b   :  { %1273 = vsyncpa [#allocation4], 1 }
 0x34c   :  { %1275 = vsyncpa [#allocation4 + $0x1], 1 }
 0x34d   :  { %1276 = vsyncpa [#allocation7], 1 }

</bundles_post_ra>
